<compile_context>
chip_gen: v6e
topology: v6e:2x2x1
jax: 0.10.0
libtpu: 0.0.40
codegen_flags: <defaults>
</compile_context>

<pallas_src>
import functools

import jax
import jax.numpy as jnp
from jax.experimental import pallas as pl
from jax.experimental.pallas import tpu as pltpu


def _spatial_tile(S, target=1024):
    """Pick an S-tile: the full S if small, else a multiple of 128 <= target."""
    if S <= target:
        return S
    return max(128, (target // 128) * 128)


def _pool_kernel(x_ref, sum_ref, max_ref, *, S, tS):
    """Accumulate per-channel sum (f32) and max over spatial tiles.

    x_ref:   (C, tS) tile of one batch element (native dtype)
    sum_ref: (C, 1) f32 output, resident across the S grid axis (accumulator)
    max_ref: (C, 1) f32 output, resident across the S grid axis (accumulator)
    """
    s = pl.program_id(1)

    @pl.when(s == 0)
    def _():
        sum_ref[...] = jnp.zeros(sum_ref.shape, sum_ref.dtype)
        max_ref[...] = jnp.full(max_ref.shape, -jnp.inf, max_ref.dtype)

    x = x_ref[...]                                       # (C, tS), native dtype

    if S % tS != 0:
        # Mask out-of-range lanes of the last partial tile.
        lane = jax.lax.broadcasted_iota(jnp.int32, x.shape, 1) + s * tS
        valid = lane < S
        x_sum = jnp.where(valid, x, jnp.zeros_like(x))
        x_max = jnp.where(valid, x, jnp.full_like(x, -jnp.inf))
    else:
        x_sum = x
        x_max = x

    # f32 accumulation without keeping a full f32 copy of the tile live.
    sum_ref[...] += jnp.sum(x_sum, axis=1, dtype=jnp.float32, keepdims=True)
    max_ref[...] = jnp.maximum(
        max_ref[...],
        jnp.max(x_max, axis=1, keepdims=True).astype(jnp.float32))


def _scale_kernel(x_ref, sig_ref, y_ref):
    """y = x * per-channel gate, elementwise in the native dtype."""
    scale = sig_ref[...].astype(x_ref.dtype)             # (C, 1)
    y_ref[...] = (x_ref[...] * scale).astype(y_ref.dtype)


def channel_gate(x, w1, b1, w2, b2, *, spatial_tile_target=1024):
    """x: (N, C, D, H, W). Returns (x * scale, sigmoid(channel_att_sum)),
    matching the PyTorch ChannelGate.forward (pool_types=['avg', 'max'])."""
    N, C, D, H, W = x.shape
    S = D * H * W
    x3 = x.reshape(N, C, S)

    tS = _spatial_tile(S, spatial_tile_target)
    nS = pl.cdiv(S, tS)

    tile_bytes = int(C) * int(tS) * x.dtype.itemsize
    # Explicit, generation-safe VMEM budget: tiles are small, so a modest limit
    # (well under v7x's 64 MiB physical VMEM) still leaves double-buffer room.
    vmem_limit = int(min(48 * 1024 * 1024,
                         max(16 * 1024 * 1024, 16 * tile_bytes)))

    # ---- pass 1: per-channel global sum + max (spatially tiled reduction) ----
    sum_out, max_out = pl.pallas_call(
        functools.partial(_pool_kernel, S=S, tS=tS),
        out_shape=(
            jax.ShapeDtypeStruct((N, C, 1), jnp.float32),
            jax.ShapeDtypeStruct((N, C, 1), jnp.float32),
        ),
        grid=(N, nS),
        in_specs=[
            pl.BlockSpec((pl.Squeezed(), C, tS), lambda n, s: (n, 0, s)),
        ],
        out_specs=(
            pl.BlockSpec((pl.Squeezed(), C, 1), lambda n, s: (n, 0, 0)),
            pl.BlockSpec((pl.Squeezed(), C, 1), lambda n, s: (n, 0, 0)),
        ),
        compiler_params=pltpu.CompilerParams(
            dimension_semantics=("parallel", "arbitrary"),
            vmem_limit_bytes=vmem_limit),
    )(x3)

    # ---- tiny shared MLP + sigmoid, hoisted to plain XLA ----
    avg = sum_out[..., 0] * (1.0 / S)                    # (N, C) f32
    mx = max_out[..., 0]                                 # (N, C) f32
    pools = jnp.concatenate([avg, mx], axis=0)           # (2N, C)
    h = jnp.maximum(pools @ w1.astype(jnp.float32) + b1.astype(jnp.float32), 0.0)
    att = h @ w2.astype(jnp.float32) + b2.astype(jnp.float32)   # (2N, C)
    sig = jax.nn.sigmoid(att[:N] + att[N:])              # (N, C) f32
    sig_col = sig[:, :, None]                            # (N, C, 1)

    # ---- pass 2: y = x * gate (spatially tiled, lane-dense stores) ----
    # Note: once profiled, pipeline_mode=pl.Buffered(3) on the x spec is a
    # cheap knob to sweep on v7x; omitted here to keep the default pipeline.
    y3 = pl.pallas_call(
        _scale_kernel,
        out_shape=jax.ShapeDtypeStruct((N, C, S), x.dtype),
        grid=(N, nS),
        in_specs=[
            pl.BlockSpec((pl.Squeezed(), C, tS), lambda n, s: (n, 0, s)),
            pl.BlockSpec((pl.Squeezed(), C, 1), lambda n, s: (n, 0, 0)),
        ],
        out_specs=pl.BlockSpec((pl.Squeezed(), C, tS), lambda n, s: (n, 0, s)),
        compiler_params=pltpu.CompilerParams(
            dimension_semantics=("parallel", "parallel"),
            vmem_limit_bytes=vmem_limit),
    )(x3, sig_col)

    return y3.reshape(N, C, D, H, W), sig


def _reference(x, w1, b1, w2, b2):
    # pure-JAX reference of the PyTorch forward
    N, C = x.shape[0], x.shape[1]
    xf = x.reshape(N, C, -1).astype(jnp.float32)
    avg = xf.mean(axis=2)
    mx = xf.max(axis=2)

    def mlp(p):
        h = jnp.maximum(p @ w1 + b1[0], 0.0)
        return h @ w2 + b2[0]

    sig = jax.nn.sigmoid(mlp(avg) + mlp(mx))
    y = x * sig[:, :, None, None, None].astype(x.dtype)
    return y, sig


if __name__ == "__main__":
    # gate_channels=64, reduction_ratio=16 -> hidden=4
    N, C, D, H, W = 2, 64, 4, 8, 8
    Ch = C // 16

    key = jax.random.PRNGKey(0)
    kx, k1, k2, k3, k4, kx2 = jax.random.split(key, 6)

    x = jax.random.normal(kx, (N, C, D, H, W), dtype=jnp.float32)
    # deterministic synthetic MLP parameters (Linear(C, Ch), Linear(Ch, C))
    w1 = jax.random.normal(k1, (C, Ch), dtype=jnp.float32) * 0.1
    b1 = jax.random.normal(k2, (1, Ch), dtype=jnp.float32) * 0.1
    w2 = jax.random.normal(k3, (Ch, C), dtype=jnp.float32) * 0.1
    b2 = jax.random.normal(k4, (1, C), dtype=jnp.float32) * 0.1

    y, sig = channel_gate(x, w1, b1, w2, b2)
    jax.block_until_ready((y, sig))

    y_ref, sig_ref = _reference(x, w1, b1, w2, b2)
    assert jnp.allclose(y, y_ref, atol=1e-5, rtol=1e-5)
    assert jnp.allclose(sig, sig_ref, atol=1e-5, rtol=1e-5)

    # Second case: spatial size (S=650) not a multiple of the S-tile (256),
    # exercising the multi-tile reduction with a masked partial last tile.
    D2, H2, W2 = 5, 10, 13
    x2 = jax.random.normal(kx2, (N, C, D2, H2, W2), dtype=jnp.float32)
    y2, sig2 = channel_gate(x2, w1, b1, w2, b2, spatial_tile_target=256)
    jax.block_until_ready((y2, sig2))

    y2_ref, sig2_ref = _reference(x2, w1, b1, w2, b2)
    assert jnp.allclose(y2, y2_ref, atol=1e-5, rtol=1e-5)
    assert jnp.allclose(sig2, sig2_ref, atol=1e-5, rtol=1e-5)

    print("KERNEL_OK")
</pallas_src>

<mosaic_0001>
module attributes {stable_mosaic.version = 11 : i64} {
  func.func @_pool_kernel(%arg0: i32, %arg1: i32, %arg2: memref<1x64x256xf32, #tpu.memory_space<vmem>>, %arg3: memref<1x64x1xf32, #tpu.memory_space<vmem>>, %arg4: memref<1x64x1xf32, #tpu.memory_space<vmem>>) attributes {dimension_semantics = [#tpu.dimension_semantics<parallel>, #tpu.dimension_semantics<arbitrary>], iteration_bounds = array<i64: 2, 1>, scalar_prefetch = 0 : i64, scratch_operands = 0 : i64, tpu.core_type = #tpu.core_type<tc>, window_params = [{transform_indices = @transform_0, window_bounds = array<i64: 1, 64, 256>}, {transform_indices = @transform_1, window_bounds = array<i64: 1, 64, 1>}, {transform_indices = @transform_2, window_bounds = array<i64: 1, 64, 1>}]} {
    %c0_i32 = arith.constant 0 : i32
    %0 = arith.cmpi eq, %arg1, %c0_i32 : i32
    %1 = arith.extui %0 : i1 to i32
    %c0_i32_0 = arith.constant 0 : i32
    %2 = arith.cmpi ne, %1, %c0_i32_0 : i32
    scf.if %2 {
      %cst_16 = arith.constant 0.000000e+00 : f32
      %21 = vector.broadcast %cst_16 : f32 to vector<64x1xf32>
      %c0_17 = arith.constant 0 : index
      %c0_18 = arith.constant 0 : index
      %c0_19 = arith.constant 0 : index
      %22 = vector.load %arg3[%c0_17, %c0_18, %c0_19] : memref<1x64x1xf32, #tpu.memory_space<vmem>>, vector<1x64x1xf32>
      %23 = vector.shape_cast %22 : vector<1x64x1xf32> to vector<64x1xf32>
      %24 = vector.shape_cast %21 : vector<64x1xf32> to vector<1x64x1xf32>
      tpu.vector_store %arg3[%c0_17, %c0_18, %c0_19], %24 {strides = array<i32>} : memref<1x64x1xf32, #tpu.memory_space<vmem>>, vector<1x64x1xf32>,
      %cst_20 = arith.constant 0xFF800000 : f32
      %25 = vector.broadcast %cst_20 : f32 to vector<64x1xf32>
      %c0_21 = arith.constant 0 : index
      %c0_22 = arith.constant 0 : index
      %c0_23 = arith.constant 0 : index
      %26 = vector.load %arg4[%c0_21, %c0_22, %c0_23] : memref<1x64x1xf32, #tpu.memory_space<vmem>>, vector<1x64x1xf32>
      %27 = vector.shape_cast %26 : vector<1x64x1xf32> to vector<64x1xf32>
      %28 = vector.shape_cast %25 : vector<64x1xf32> to vector<1x64x1xf32>
      tpu.vector_store %arg4[%c0_21, %c0_22, %c0_23], %28 {strides = array<i32>} : memref<1x64x1xf32, #tpu.memory_space<vmem>>, vector<1x64x1xf32>,
    } else {
    }
    %c0 = arith.constant 0 : index
    %c0_1 = arith.constant 0 : index
    %c0_2 = arith.constant 0 : index
    %3 = vector.load %arg2[%c0, %c0_1, %c0_2] : memref<1x64x256xf32, #tpu.memory_space<vmem>>, vector<1x64x256xf32>
    %4 = vector.shape_cast %3 : vector<1x64x256xf32> to vector<64x256xf32>
    %c0_3 = arith.constant 0 : index
    %c0_4 = arith.constant 0 : index
    %c0_5 = arith.constant 0 : index
    %5 = vector.load %arg3[%c0_3, %c0_4, %c0_5] : memref<1x64x1xf32, #tpu.memory_space<vmem>>, vector<1x64x1xf32>
    %6 = vector.shape_cast %5 : vector<1x64x1xf32> to vector<64x1xf32>
    %cst = arith.constant dense<0.000000e+00> : vector<64xf32>
    %7 = vector.multi_reduction <add>, %4, %cst [1] : vector<64x256xf32> to vector<64xf32>
    %8 = vector.shape_cast %7 : vector<64xf32> to vector<64x1xf32>
    %9 = arith.addf %6, %8 : vector<64x1xf32>
    %c0_6 = arith.constant 0 : index
    %c0_7 = arith.constant 0 : index
    %c0_8 = arith.constant 0 : index
    %10 = vector.load %arg3[%c0_6, %c0_7, %c0_8] : memref<1x64x1xf32, #tpu.memory_space<vmem>>, vector<1x64x1xf32>
    %11 = vector.shape_cast %10 : vector<1x64x1xf32> to vector<64x1xf32>
    %12 = vector.shape_cast %9 : vector<64x1xf32> to vector<1x64x1xf32>
    tpu.vector_store %arg3[%c0_6, %c0_7, %c0_8], %12 {strides = array<i32>} : memref<1x64x1xf32, #tpu.memory_space<vmem>>, vector<1x64x1xf32>,
    %c0_9 = arith.constant 0 : index
    %c0_10 = arith.constant 0 : index
    %c0_11 = arith.constant 0 : index
    %13 = vector.load %arg4[%c0_9, %c0_10, %c0_11] : memref<1x64x1xf32, #tpu.memory_space<vmem>>, vector<1x64x1xf32>
    %14 = vector.shape_cast %13 : vector<1x64x1xf32> to vector<64x1xf32>
    %cst_12 = arith.constant dense<0xFF800000> : vector<64xf32>
    %15 = vector.multi_reduction <maximumf>, %4, %cst_12 [1] : vector<64x256xf32> to vector<64xf32>
    %16 = vector.shape_cast %15 : vector<64xf32> to vector<64x1xf32>
    %17 = arith.maximumf %14, %16 : vector<64x1xf32>
    %c0_13 = arith.constant 0 : index
    %c0_14 = arith.constant 0 : index
    %c0_15 = arith.constant 0 : index
    %18 = vector.load %arg4[%c0_13, %c0_14, %c0_15] : memref<1x64x1xf32, #tpu.memory_space<vmem>>, vector<1x64x1xf32>
    %19 = vector.shape_cast %18 : vector<1x64x1xf32> to vector<64x1xf32>
    %20 = vector.shape_cast %17 : vector<64x1xf32> to vector<1x64x1xf32>
    tpu.vector_store %arg4[%c0_13, %c0_14, %c0_15], %20 {strides = array<i32>} : memref<1x64x1xf32, #tpu.memory_space<vmem>>, vector<1x64x1xf32>,
    return
  }
  func.func @transform_0(%arg0: i32, %arg1: i32) -> (i32, i32, i32) {
    %c0_i32 = arith.constant 0 : i32
    %c0_i32_0 = arith.constant 0 : i32
    return %arg0, %c0_i32, %arg1 : i32, i32, i32
  }
  func.func @transform_1(%arg0: i32, %arg1: i32) -> (i32, i32, i32) {
    %c0_i32 = arith.constant 0 : i32
    %c0_i32_0 = arith.constant 0 : i32
    %c0_i32_1 = arith.constant 0 : i32
    return %arg0, %c0_i32, %c0_i32_0 : i32, i32, i32
  }
  func.func @transform_2(%arg0: i32, %arg1: i32) -> (i32, i32, i32) {
    %c0_i32 = arith.constant 0 : i32
    %c0_i32_0 = arith.constant 0 : i32
    %c0_i32_1 = arith.constant 0 : i32
    return %arg0, %c0_i32, %c0_i32_0 : i32, i32, i32
  }
}

</mosaic_0001>

<bundles_post_ra>
// kernel: tpu_custom_call.1
= control target key start
LH: loop header
LB: loop body
LE: loop exit
PB: predicated region body
PF: predicated region fallthrough
CT: control target
= control target key end

     0   :  { %8 = vsyncpa [#allocation3], 0  ;;  %s824_s0 = inlined_call_operand.hbm [shape: f32[2,64,256], index: 0, kind: input, shape index: {}]   ;;  %s825_s1 = inlined_call_operand.vmem [shape: f32[2,64,1], index: 1, kind: output, shape index: {0}]   ;;  %s826_s2 = inlined_call_operand.vmem [shape: f32[2,64,1], index: 2, kind: output, shape index: {1}]  }
   0x1   :  { %10 = vsyncpa [#allocation3 + $0x1], 0  ;;  %s616_s9 = smov 0   ;;  %s618_s10 = smov 0  }
   0x2   :  { %s620_s11 = smov 0   ;;  %s622_s12 = smov 0  }
   0x3   :  { %s624_s13 = smov 0   ;;  %s626_s14 = smov 0  }
   0x4 LB: > { %s439_s15 = sadd.s32 4294967295, %s594_s14   ;;  %s28_s16 = sadd.s32 1, %s590_s13  ;;  %s594_s14 = sphi %s626_s14, %s16_s14   ;;  %s590_s13 = sphi %s624_s13, %s834_s13   ;;  %s586_s12 = sphi %s622_s12, %s833_s12   ;;  %s582_s11 = sphi %s620_s11, %s832_s11   ;;  %s578_s10 = sphi %s618_s10, %s831_s10   ;;  %s574_s9 = sphi %s616_s9, %s830_s9  }
   0x5   : > { %p30_p0 = scmp.ge.s32.totalorder %s28_s16, 2  ;;  %s37_s17 = sadd.s32 1, %s582_s11 }
   0x6   : > { %p44_p1 = scmp.ne.s32.totalorder %s582_s11, %s578_s10  ;;  %p45_p2 = scmp.eq.s32.totalorder %s594_s14, 0 }
   0x7   : > { %s836_s16 = smov (%p30_p0, %s28_s16), 0  ;;  %p50_p4 = scmp.ne.s32.totalorder %s578_s10, %s574_s9 }
   0x8   : > { %p652_p3 = por %p45_p2, %p44_p1  ;;  %s32_s19 = ssub.s32 %s590_s13, %s836_s16 }
   0x9   : > { %p51_p5 = scmp.eq.s32.totalorder %s439_s15, 0  ;;  %p35_p6 = scmp.eq.s32.totalorder %s32_s19, 0 }
   0xa   : > { %p463_p8 = scmp.lt.s32.totalorder %s594_s14, 2  ;;  %s126_s22 = sand.u32 1, %s582_s11  }
   0xb   : > { %p659_p7 = por %p51_p5, %p50_p4  ;;  %s454_s23 = sshll.u32 %s590_s13, 11 }
   0xc   : > { %s665_s21 = scalar_select %p35_p6, %s582_s11, %s37_s17  }
   0xd   : > { %s443_s24 = sshll.u32 %s126_s22, 7  ;;  %s138_s27 = scalar_lea.hbm %s824_s0, %s454_s23 }
   0xe   : > { %s130_s28 = scalar_lea.vmem [#allocation2], %s443_s24  ;;  %p674_p9 = pnand %p463_p8, %p652_p3 }
   0xf   : > { %s139_s29 = sshll.u32 %s130_s28, 4  ;;  %s127_s3 = scalar_lea.sflag [#allocation3], %s126_s22  ;;  %s140_s29 = int_to_ptr.vmem [resolvable:$true] %s139_s29 }
  0x10   : > { %p518_p10 = pneg %p674_p9  ;;  %s529_s4 = scalar_lea.vmem %s140_s29, 2048 }
  0x11   : > { %p530_p11 = scmp.ne.s32.totalorder %s140_s29, %s529_s4  ;;  %s596_s5 = smov [#allocation2]  }
  0x12   : > { %s534_s6 = sshll.u32 %s596_s5, 4  ;;  %s535_s6 = int_to_ptr.vmem [resolvable:$false] %s534_s6 }
  0x13   : > { %p532_p12 = pnand %p530_p11, %p518_p10  ;;  %s536_s7 = scalar_lea.vmem %s535_s6, 4096 }
  0x14   : > { %p537_p0 = scmp.lt.s32.totalorder %s140_s29, %s535_s6  ;;  %p538_p1 = scmp.lt.s32.totalorder %s536_s7, %s529_s4 }
  0x15   : > { %p533_p13 = pneg %p532_p12 }
  0x16   : > { %p539_p2 = por %p538_p1, %p537_p0 }
  0x18   : > { %p540_p3 = pnand %p539_p2, %p533_p13 }
  0x1a   : > { %543 = shalt.err (!%p540_p3)
}
  0x1b   : > { %s597_s8 = smov 256   ;;  %s598_s9 = smov 16  }
  0x1c   : > { %462 = dma.hbm_to_vmem [thread:$0]  (!%p674_p9), %s138_s27, 2048, %s140_s29, %s127_s3, %s597_s8, %s597_s8, %s598_s9  }
  0x1d   : > { %p446_p4 = scmp.ge.s32.totalorder %s594_s14, 1  ;;  %p147_p5 = scmp.lt.s32.totalorder %s594_s14, 3 }
  0x1f   : > { %p148_p6 = pnand %p446_p4, %p147_p5 }
  0x20   : > { %s153_s15 = sand.u32 (!%p148_p6), 1, %s578_s10  }
  0x21   : > { %151 = sbr.rel (%p148_p6) target bundleno = 212 (0xd4), region = 24  ;;  %s447_s17 = sshll.u32 (!%p148_p6), %s153_s15, 7 }
  0x22   : > { %s154_s18 = scalar_lea.sflag (!%p148_p6), [#allocation3], %s153_s15  ;;  %s685_s19 = scalar_lea.vmem (!%p148_p6), [#allocation2], %s447_s17 }
  0x26   : > { %569 = dma.done.wait (%p659_p7), %s154_s18, 2048  }
  0x27   : > { %571 = vsyncadd (%p659_p7), %s154_s18, 4294965248  ;;  %p184_p8 = scmp.lt.s32.totalorder %s586_s12, 1  ;;  %vm198_vm0 = vcmask 7168   ;;  %v599_v0 = vmov 0.0   ;;  %v219_v1 = vld [vmem:[%s685_s19 + $0x20] sm:$0xff]  ;;  %v220_v2 = vld [vmem:[%s685_s19 + $0x28] sm:$0xff] }
  0x28   : > { %v215_v3 = vld [vmem:[%s685_s19] sm:$0xff]  ;;  %v245_v4 = vadd.f32 %v220_v2, %v219_v1  ;;  %v216_v5 = vld [vmem:[%s685_s19 + $0x8] sm:$0xff]  ;;  %v221_v6 = vld [vmem:[%s685_s19 + $0x30] sm:$0xff]  ;;  %v294_v28 = vmax.f32 %v219_v1, %v220_v2  ;;  %v600_v29 = vmov -inf  }
  0x29   : > { %s838_s12 = smov (!%p184_p8, %s586_s12), 1  ;;  %v222_v7 = vld [vmem:[%s685_s19 + $0x38] sm:$0xff]  ;;  %v239_v8 = vadd.f32 %v216_v5, %v215_v3  ;;  %v217_v9 = vld [vmem:[%s685_s19 + $0x10] sm:$0xff]  ;;  %v223_v15 = vld [vmem:[%s685_s19 + $0x40] sm:$0xff]  ;;  %v288_v26 = vmax.f32 %v215_v3, %v216_v5 }
  0x2a   : > { %s455_s22 = sshll.u32 %s838_s12, 6  ;;  %v218_v10 = vld [vmem:[%s685_s19 + $0x18] sm:$0xff]  ;;  %246 = vadd.xlane.f32.xlu1 %v245_v4  ;;  %v248_v11 = vadd.f32 %v222_v7, %v221_v6  ;;  %v225_v13 = vld [vmem:[%s685_s19 + $0x50] sm:$0xff]  ;;  %v224_v16 = vld [vmem:[%s685_s19 + $0x48] sm:$0xff]  ;;  %v297_v27 = vmax.f32 %v221_v6, %v222_v7 }
  0x2b   : > { %s701_s20 = scalar_lea.vmem %s825_s1, %s455_s22  ;;  %240 = vadd.xlane.f32.xlu0 %v239_v8  ;;  %v242_v12 = vadd.f32 %v218_v10, %v217_v9  ;;  %v226_v14 = vld [vmem:[%s685_s19 + $0x58] sm:$0xff]  ;;  %v251_v18 = vadd.f32 %v224_v16, %v223_v15  ;;  %v229_v19 = vld [vmem:[%s685_s19 + $0x70] sm:$0xff]  ;;  %v227_v21 = vld [vmem:[%s685_s19 + $0x60] sm:$0xff]  ;;  %v291_v25 = vmax.f32 %v217_v9, %v218_v10  ;;  %s740_s27 = scalar_lea.vmem %s826_s2, %s455_s22  ;;  %v300_v31 = vmax.f32 %v223_v15, %v224_v16 }
  0x2c   : > { %201 = vst.msk [vmem:[%s701_s20 + $0x10] sm:$0xff] %vm198_vm0, %v599_v0  ;;  %199 = vst.msk [vmem:[%s701_s20] sm:$0xff] %vm198_vm0, %v599_v0  ;;  %v254_v17 = vadd.f32 %v226_v14, %v225_v13  ;;  %v230_v20 = vld [vmem:[%s685_s19 + $0x78] sm:$0xff]  ;;  %v228_v22 = vld [vmem:[%s685_s19 + $0x68] sm:$0xff]  ;;  %v303_v30 = vmax.f32 %v225_v13, %v226_v14 }
  0x2d   : > { %200 = vst.msk [vmem:[%s701_s20 + $0x8] sm:$0xff] %vm198_vm0, %v599_v0  ;;  %202 = vst.msk [vmem:[%s701_s20 + $0x18] sm:$0xff] %vm198_vm0, %v599_v0  ;;  %v260_v23 = vadd.f32 %v230_v20, %v229_v19  ;;  %v257_v24 = vadd.f32 %v228_v22, %v227_v21  ;;  %v309_v32 = vmax.f32 %v229_v19, %v230_v20 }
  0x2e   : > { %203 = vst.msk [vmem:[%s701_s20 + $0x20] sm:$0xff] %vm198_vm0, %v599_v0  ;;  %204 = vst.msk [vmem:[%s701_s20 + $0x28] sm:$0xff] %vm198_vm0, %v599_v0  ;;  %249 = vadd.xlane.f32.xlu1 %v248_v11  ;;  %v306_v33 = vmax.f32 %v227_v21, %v228_v22 }
  0x2f   : > { %205 = vst.msk [vmem:[%s701_s20 + $0x30] sm:$0xff] %vm198_vm0, %v599_v0  ;;  %206 = vst.msk [vmem:[%s701_s20 + $0x38] sm:$0xff] %vm198_vm0, %v599_v0  ;;  %243 = vadd.xlane.f32.xlu0 %v242_v12 }
  0x30   : > { %208 = vst.msk [vmem:[%s740_s27 + $0x8] sm:$0xff] %vm198_vm0, %v600_v29  ;;  %207 = vst.msk [vmem:[%s740_s27] sm:$0xff] %vm198_vm0, %v600_v29 }
  0x31   : > { %209 = vst.msk [vmem:[%s740_s27 + $0x10] sm:$0xff] %vm198_vm0, %v600_v29  ;;  %210 = vst.msk [vmem:[%s740_s27 + $0x18] sm:$0xff] %vm198_vm0, %v600_v29 }
  0x32   : > { %255 = vadd.xlane.f32.xlu1 %v254_v17  ;;  %211 = vst.msk [vmem:[%s740_s27 + $0x20] sm:$0xff] %vm198_vm0, %v600_v29  ;;  %212 = vst.msk [vmem:[%s740_s27 + $0x28] sm:$0xff] %vm198_vm0, %v600_v29 }
  0x33   : > { %252 = vadd.xlane.f32.xlu0 %v251_v18  ;;  %213 = vst.msk [vmem:[%s740_s27 + $0x30] sm:$0xff] %vm198_vm0, %v600_v29  ;;  %214 = vst.msk [vmem:[%s740_s27 + $0x38] sm:$0xff] %vm198_vm0, %v600_v29  ;;  %v233_v34 = vld [vmem:[%s701_s20 + $0x10] sm:$0xff]  ;;  %v231_v35 = vld [vmem:[%s701_s20] sm:$0xff] }
  0x34   : > { %v234_v40 = vld [vmem:[%s701_s20 + $0x18] sm:$0xff]  ;;  %v232_v41 = vld [vmem:[%s701_s20 + $0x8] sm:$0xff] }
  0x35   : > { %v236_v46 = vld [vmem:[%s701_s20 + $0x28] sm:$0xff]  ;;  %v235_v47 = vld [vmem:[%s701_s20 + $0x20] sm:$0xff] }
  0x36   : > { %261 = vadd.xlane.f32.xlu1 %v260_v23  ;;  %v238_v52 = vld [vmem:[%s701_s20 + $0x38] sm:$0xff]  ;;  %v237_v53 = vld [vmem:[%s701_s20 + $0x30] sm:$0xff] }
  0x37   : > { %258 = vadd.xlane.f32.xlu0 %v257_v24  ;;  %v281_v58 = vld [vmem:[%s740_s27 + $0x8] sm:$0xff]  ;;  %v280_v59 = vld [vmem:[%s740_s27] sm:$0xff] }
  0x38   : > { %v283_v0 = vld [vmem:[%s740_s27 + $0x18] sm:$0xff]  ;;  %v282_v1 = vld [vmem:[%s740_s27 + $0x10] sm:$0xff] }
  0x39   : > { %v285_v6 = vld [vmem:[%s740_s27 + $0x28] sm:$0xff]  ;;  %v284_v7 = vld [vmem:[%s740_s27 + $0x20] sm:$0xff] }
  0x3a   : > { %292 = vmax.xlane.f32.xlu1 %v291_v25  ;;  %v287_v12 = vld [vmem:[%s740_s27 + $0x38] sm:$0xff]  ;;  %v286_v13 = vld [vmem:[%s740_s27 + $0x30] sm:$0xff] }
  0x3b   : > { %289 = vmax.xlane.f32.xlu0 %v288_v26 }
  0x3e   : > { %298 = vmax.xlane.f32.xlu1 %v297_v27 }
  0x3f   : > { %295 = vmax.xlane.f32.xlu0 %v294_v28 }
  0x42   : > { %304 = vmax.xlane.f32.xlu1 %v303_v30 }
  0x43   : > { %301 = vmax.xlane.f32.xlu0 %v300_v31 }
  0x46   : > { %310 = vmax.xlane.f32.xlu1 %v309_v32 }
  0x47   : > { %307 = vmax.xlane.f32.xlu0 %v306_v33 }
  0xb3   : > { %v247_v36 = vpop.xlane.xlu1 %246 }
  0xb4   : > { %v265_v37 = vadd.f32 %v247_v36, %v233_v34  ;;  %v241_v38 = vpop.xlane.xlu0 %240 }
  0xb5   : > { %v263_v39 = vadd.f32 %v241_v38, %v231_v35 }
  0xb6   : > { %274 = vst.msk [vmem:[%s701_s20 + $0x10] sm:$0xff] %vm198_vm0, %v265_v37 }
  0xb7   : > { %272 = vst.msk [vmem:[%s701_s20] sm:$0xff] %vm198_vm0, %v263_v39  ;;  %v250_v42 = vpop.xlane.xlu1 %249 }
  0xb8   : > { %v266_v43 = vadd.f32 %v250_v42, %v234_v40  ;;  %v244_v44 = vpop.xlane.xlu0 %243 }
  0xb9   : > { %v264_v45 = vadd.f32 %v244_v44, %v232_v41 }
  0xba   : > { %275 = vst.msk [vmem:[%s701_s20 + $0x18] sm:$0xff] %vm198_vm0, %v266_v43 }
  0xbb   : > { %273 = vst.msk [vmem:[%s701_s20 + $0x8] sm:$0xff] %vm198_vm0, %v264_v45  ;;  %v256_v48 = vpop.xlane.xlu1 %255 }
  0xbc   : > { %v268_v49 = vadd.f32 %v256_v48, %v236_v46  ;;  %v253_v50 = vpop.xlane.xlu0 %252 }
  0xbd   : > { %v267_v51 = vadd.f32 %v253_v50, %v235_v47 }
  0xbe   : > { %277 = vst.msk [vmem:[%s701_s20 + $0x28] sm:$0xff] %vm198_vm0, %v268_v49 }
  0xbf   : > { %276 = vst.msk [vmem:[%s701_s20 + $0x20] sm:$0xff] %vm198_vm0, %v267_v51  ;;  %v262_v54 = vpop.xlane.xlu1 %261 }
  0xc0   : > { %v270_v55 = vadd.f32 %v262_v54, %v238_v52  ;;  %v259_v56 = vpop.xlane.xlu0 %258 }
  0xc1   : > { %v269_v57 = vadd.f32 %v259_v56, %v237_v53 }
  0xc2   : > { %279 = vst.msk [vmem:[%s701_s20 + $0x38] sm:$0xff] %vm198_vm0, %v270_v55 }
  0xc3   : > { %278 = vst.msk [vmem:[%s701_s20 + $0x30] sm:$0xff] %vm198_vm0, %v269_v57  ;;  %v293_v60 = vpop.xlane.xlu1 %292 }
  0xc4   : > { %v313_v61 = vmax.f32 %v281_v58, %v293_v60  ;;  %v290_v62 = vpop.xlane.xlu0 %289 }
  0xc5   : > { %v312_v63 = vmax.f32 %v280_v59, %v290_v62 }
  0xc6   : > { %321 = vst.msk [vmem:[%s740_s27 + $0x8] sm:$0xff] %vm198_vm0, %v313_v61 }
  0xc7   : > { %320 = vst.msk [vmem:[%s740_s27] sm:$0xff] %vm198_vm0, %v312_v63  ;;  %v299_v2 = vpop.xlane.xlu1 %298 }
  0xc8   : > { %v315_v3 = vmax.f32 %v283_v0, %v299_v2  ;;  %v296_v4 = vpop.xlane.xlu0 %295 }
  0xc9   : > { %v314_v5 = vmax.f32 %v282_v1, %v296_v4 }
  0xca   : > { %323 = vst.msk [vmem:[%s740_s27 + $0x18] sm:$0xff] %vm198_vm0, %v315_v3 }
  0xcb   : > { %322 = vst.msk [vmem:[%s740_s27 + $0x10] sm:$0xff] %vm198_vm0, %v314_v5  ;;  %v305_v8 = vpop.xlane.xlu1 %304 }
  0xcc   : > { %v317_v9 = vmax.f32 %v285_v6, %v305_v8  ;;  %v302_v10 = vpop.xlane.xlu0 %301 }
  0xcd   : > { %v316_v11 = vmax.f32 %v284_v7, %v302_v10 }
  0xce   : > { %325 = vst.msk [vmem:[%s740_s27 + $0x28] sm:$0xff] %vm198_vm0, %v317_v9 }
  0xcf   : > { %324 = vst.msk [vmem:[%s740_s27 + $0x20] sm:$0xff] %vm198_vm0, %v316_v11  ;;  %v311_v14 = vpop.xlane.xlu1 %310 }
  0xd0   : > { %v319_v15 = vmax.f32 %v287_v12, %v311_v14  ;;  %v308_v16 = vpop.xlane.xlu0 %307 }
  0xd1   : > { %v318_v17 = vmax.f32 %v286_v13, %v308_v16 }
  0xd2   : > { %327 = vst.msk [vmem:[%s740_s27 + $0x38] sm:$0xff] %vm198_vm0, %v319_v15 }
  0xd3   : > { %326 = vst.msk [vmem:[%s740_s27 + $0x30] sm:$0xff] %vm198_vm0, %v318_v17 }
  0xd4 PF: > { %s16_s14 = sadd.s32 1, %s594_s14   ;;  %s830_s9 = smov %s578_s10 }
  0xd5   : > { %p13_p7 = scmp.ge.s32.totalorder %s16_s14, 4   ;;  %s831_s10 = smov %s582_s11 }
  0xd6   : > { %s832_s11 = smov %s665_s21  ;;  %s833_s12 = smov %s590_s13 }
  0xd7   : > { %s834_s13 = smov %s836_s16  ;;  %15 = sbr.rel (!%p13_p7) target bundleno = 4 (0x4), region = 80 }
  0xdc   :  { %365 = vsyncpa [#allocation3], 1 }
  0xdd   :  { %367 = vsyncpa [#allocation3 + $0x1], 1 }

</bundles_post_ra>
